<compile_context>
chip_gen: v6e
topology: v6e:2x2x1
jax: 0.10.0
libtpu: 0.0.40
codegen_flags: <defaults>
</compile_context>

<pallas_src>
import jax
import jax.numpy as jnp
from jax.experimental import pallas as pl
from jax.experimental.pallas import tpu as pltpu

EPS = 1e-5  # PyTorch nn.LayerNorm default


def _round_up(n, m):
    return ((n + m - 1) // m) * m


def sublayer_connection_kernel(x_ref, gamma_ref, beta_ref, w_ref, b_ref, o_ref):
    # x_ref: (TM, H) row tile of the flattened (batch*seq, hidden) input.
    x = x_ref[...].astype(jnp.float32)

    # Hoisted parameter loads/broadcasts (done once per tile, never inside loops).
    gamma = gamma_ref[...].astype(jnp.float32)
    beta = beta_ref[...].astype(jnp.float32)
    bias = b_ref[...].astype(jnp.float32)

    # --- LayerNorm over hidden dim: single-pass E[x^2] - mean^2, f32 stats ---
    mean = jnp.mean(x, axis=-1, keepdims=True)
    mean_sq = jnp.mean(x * x, axis=-1, keepdims=True)
    var = jnp.maximum(mean_sq - mean * mean, 0.0)
    x_hat = (x - mean) * jax.lax.rsqrt(var + EPS)
    y = x_hat * gamma + beta

    # --- sublayer: Linear(H -> H) on the MXU, bf16 inputs / f32 accumulation ---
    z = jnp.dot(y.astype(jnp.bfloat16), w_ref[...],
                preferred_element_type=jnp.float32) + bias

    # --- dropout (eval mode => identity) + residual add (residual exact in f32) ---
    # TODO(synk): train-mode dropout (scaled Bernoulli mask via pltpu.prng_*) not implemented.
    o_ref[...] = (x + z).astype(o_ref.dtype)


def sublayer_connection(x, gamma, beta, w, b, *, tile_rows=256):
    """x: (B, S, H). Returns x + Linear(LayerNorm(x)) (eval-mode dropout)."""
    B, S, H = x.shape
    N = B * S

    # Row tile: large enough to feed the MXU, never larger than the (8-aligned)
    # row count; pad rows so the grid divides evenly (padded rows are discarded).
    tile_rows = max(8, min(tile_rows, _round_up(N, 8)))
    tile_rows = _round_up(tile_rows, 8)
    n_pad = _round_up(N, tile_rows)

    x2d = x.reshape(N, H)
    if n_pad != N:
        x2d = jnp.pad(x2d, ((0, n_pad - N), (0, 0)))

    gamma2d = gamma.reshape(1, H).astype(jnp.float32)
    beta2d = beta.reshape(1, H).astype(jnp.float32)
    b2d = b.reshape(1, H).astype(jnp.float32)
    # bf16 weight: halves the VMEM/HBM footprint of W and runs the MXU at bf16 rate.
    w_bf16 = w.astype(jnp.bfloat16)

    # Explicit VMEM budget: double-buffered x/out tiles + double-buffered bf16 W
    # + params, with 2x headroom, clamped to stay within every chip's physical VMEM.
    est = (2 * tile_rows * H * 4                      # x tiles (f32), double-buffered
           + 2 * tile_rows * H * x.dtype.itemsize     # out tiles, double-buffered
           + 2 * H * H * 2                            # W (bf16), double-buffered
           + 3 * H * 4)                               # gamma / beta / bias
    vmem_limit = int(min(max(2 * est, 8 * 1024 * 1024), 64 * 1024 * 1024))

    out2d = pl.pallas_call(
        sublayer_connection_kernel,
        out_shape=jax.ShapeDtypeStruct((n_pad, H), x.dtype),
        grid_spec=pltpu.PrefetchScalarGridSpec(
            num_scalar_prefetch=0,
            grid=(n_pad // tile_rows,),
            in_specs=[
                pl.BlockSpec((tile_rows, H), lambda i: (i, 0)),  # x row tile
                pl.BlockSpec((1, H), lambda i: (0, 0)),          # gamma
                pl.BlockSpec((1, H), lambda i: (0, 0)),          # beta
                # TODO(synk): for very large H (>= ~4096) on v7x (64 MiB VMEM),
                # tile W's output-column dim on an extra 'arbitrary' grid axis
                # with an f32 accumulator instead of keeping full H x H resident.
                pl.BlockSpec((H, H), lambda i: (0, 0)),          # W (bf16)
                pl.BlockSpec((1, H), lambda i: (0, 0)),          # bias
            ],
            out_specs=pl.BlockSpec((tile_rows, H), lambda i: (i, 0)),
        ),
        compiler_params=pltpu.CompilerParams(
            dimension_semantics=("parallel",),   # shards row tiles across TCs (v7x)
            vmem_limit_bytes=vmem_limit,
        ),
    )(x2d, gamma2d, beta2d, w_bf16, b2d)

    return out2d[:N].reshape(B, S, H)


if __name__ == "__main__":
    # Small shapes implied by the module: (batch, seq, hidden), LayerNorm(hidden)
    B, S, H = 2, 8, 32
    key = jax.random.PRNGKey(0)
    kx, kw, kb = jax.random.split(key, 3)

    x = jax.random.normal(kx, (B, S, H), dtype=jnp.float32)

    # LayerNorm params: PyTorch defaults (weight=1, bias=0)
    gamma = jnp.ones((H,), dtype=jnp.float32)
    beta = jnp.zeros((H,), dtype=jnp.float32)

    # Deterministic sublayer (Linear H->H) params
    w = jax.random.normal(kw, (H, H), dtype=jnp.float32) * (1.0 / jnp.sqrt(H))
    b = jax.random.normal(kb, (H,), dtype=jnp.float32) * 0.01

    out = sublayer_connection(x, gamma, beta, w, b)
    jax.block_until_ready(out)

    # Pure-JAX f32 reference (LayerNorm -> Linear -> identity dropout -> residual).
    mean = jnp.mean(x, axis=-1, keepdims=True)
    var = jnp.mean((x - mean) ** 2, axis=-1, keepdims=True)
    y_ref = (x - mean) / jnp.sqrt(var + EPS) * gamma + beta
    ref = x + (y_ref @ w + b)
    # Linear branch runs on the MXU in bf16 (f32 accumulate) -> loosen tolerance;
    # the residual path (x) is exact f32.
    assert jnp.allclose(out, ref, atol=5e-2, rtol=5e-2), "mismatch vs reference"

    print("KERNEL_OK")
</pallas_src>

<mosaic_0001>
module attributes {stable_mosaic.version = 11 : i64} {
  func.func @sublayer_connection_kernel(%arg0: i32, %arg1: memref<16x32xf32, #tpu.memory_space<vmem>>, %arg2: memref<1x32xf32, #tpu.memory_space<vmem>>, %arg3: memref<1x32xf32, #tpu.memory_space<vmem>>, %arg4: memref<32x32xbf16, #tpu.memory_space<vmem>>, %arg5: memref<1x32xf32, #tpu.memory_space<vmem>>, %arg6: memref<16x32xf32, #tpu.memory_space<vmem>>) attributes {dimension_semantics = [#tpu.dimension_semantics<parallel>], iteration_bounds = array<i64: 1>, scalar_prefetch = 0 : i64, scratch_operands = 0 : i64, tpu.core_type = #tpu.core_type<tc>, window_params = [{transform_indices = @transform_0, window_bounds = array<i64: 16, 32>}, {pipeline_mode = #tpu.pipeline_mode<synchronous>, transform_indices = @transform_1, window_bounds = array<i64: 1, 32>}, {pipeline_mode = #tpu.pipeline_mode<synchronous>, transform_indices = @transform_2, window_bounds = array<i64: 1, 32>}, {pipeline_mode = #tpu.pipeline_mode<synchronous>, transform_indices = @transform_3, window_bounds = array<i64: 32, 32>}, {pipeline_mode = #tpu.pipeline_mode<synchronous>, transform_indices = @transform_4, window_bounds = array<i64: 1, 32>}, {transform_indices = @transform_5, window_bounds = array<i64: 16, 32>}]} {
    %c0 = arith.constant 0 : index
    %c0_0 = arith.constant 0 : index
    %0 = vector.load %arg1[%c0, %c0_0] : memref<16x32xf32, #tpu.memory_space<vmem>>, vector<16x32xf32>
    %c0_1 = arith.constant 0 : index
    %c0_2 = arith.constant 0 : index
    %1 = vector.load %arg2[%c0_1, %c0_2] : memref<1x32xf32, #tpu.memory_space<vmem>>, vector<1x32xf32>
    %c0_3 = arith.constant 0 : index
    %c0_4 = arith.constant 0 : index
    %2 = vector.load %arg3[%c0_3, %c0_4] : memref<1x32xf32, #tpu.memory_space<vmem>>, vector<1x32xf32>
    %c0_5 = arith.constant 0 : index
    %c0_6 = arith.constant 0 : index
    %3 = vector.load %arg5[%c0_5, %c0_6] : memref<1x32xf32, #tpu.memory_space<vmem>>, vector<1x32xf32>
    %cst = arith.constant dense<0.000000e+00> : vector<16xf32>
    %4 = vector.multi_reduction <add>, %0, %cst [1] : vector<16x32xf32> to vector<16xf32>
    %5 = vector.shape_cast %4 : vector<16xf32> to vector<16x1xf32>
    %cst_7 = arith.constant 3.200000e+01 : f32
    %6 = vector.broadcast %cst_7 : f32 to vector<16x1xf32>
    %7 = arith.divf %5, %6 : vector<16x1xf32>
    %8 = arith.mulf %0, %0 : vector<16x32xf32>
    %cst_8 = arith.constant dense<0.000000e+00> : vector<16xf32>
    %9 = vector.multi_reduction <add>, %8, %cst_8 [1] : vector<16x32xf32> to vector<16xf32>
    %10 = vector.shape_cast %9 : vector<16xf32> to vector<16x1xf32>
    %cst_9 = arith.constant 3.200000e+01 : f32
    %11 = vector.broadcast %cst_9 : f32 to vector<16x1xf32>
    %12 = arith.divf %10, %11 : vector<16x1xf32>
    %13 = arith.mulf %7, %7 : vector<16x1xf32>
    %14 = arith.subf %12, %13 : vector<16x1xf32>
    %cst_10 = arith.constant 0.000000e+00 : f32
    %15 = vector.broadcast %cst_10 : f32 to vector<16x1xf32>
    %16 = arith.maximumf %14, %15 : vector<16x1xf32>
    %17 = vector.broadcast %7 : vector<16x1xf32> to vector<16x32xf32>
    %18 = arith.subf %0, %17 : vector<16x32xf32>
    %cst_11 = arith.constant 9.99999974E-6 : f32
    %19 = vector.broadcast %cst_11 : f32 to vector<16x1xf32>
    %20 = arith.addf %16, %19 : vector<16x1xf32>
    %21 = math.rsqrt %20 : vector<16x1xf32>
    %22 = vector.broadcast %21 : vector<16x1xf32> to vector<16x32xf32>
    %23 = arith.mulf %18, %22 : vector<16x32xf32>
    %24 = vector.broadcast %1 : vector<1x32xf32> to vector<16x32xf32>
    %25 = arith.mulf %23, %24 : vector<16x32xf32>
    %26 = vector.broadcast %2 : vector<1x32xf32> to vector<16x32xf32>
    %27 = arith.addf %25, %26 : vector<16x32xf32>
    %28 = arith.truncf %27 : vector<16x32xf32> to vector<16x32xbf16>
    %c0_12 = arith.constant 0 : index
    %c0_13 = arith.constant 0 : index
    %29 = vector.load %arg4[%c0_12, %c0_13] : memref<32x32xbf16, #tpu.memory_space<vmem>>, vector<32x32xbf16>
    %cst_14 = arith.constant dense<0.000000e+00> : vector<16x32xf32>
    %30 = tpu.matmul %28, %29, %cst_14 {dimension_numbers = #tpu.dot_dimension_numbers<[1], [0], [0], [1], [0, 0, 1, 1], [], []>} : vector<16x32xbf16>, vector<32x32xbf16>, vector<16x32xf32> -> vector<16x32xf32>
    %31 = vector.broadcast %3 : vector<1x32xf32> to vector<16x32xf32>
    %32 = arith.addf %30, %31 : vector<16x32xf32>
    %33 = arith.addf %0, %32 : vector<16x32xf32>
    %c0_15 = arith.constant 0 : index
    %c0_16 = arith.constant 0 : index
    %34 = vector.load %arg6[%c0_15, %c0_16] : memref<16x32xf32, #tpu.memory_space<vmem>>, vector<16x32xf32>
    tpu.vector_store %arg6[%c0_15, %c0_16], %33 {strides = array<i32>} : memref<16x32xf32, #tpu.memory_space<vmem>>, vector<16x32xf32>,
    return
  }
  func.func @transform_0(%arg0: i32) -> (i32, i32) {
    %c0_i32 = arith.constant 0 : i32
    %c0_i32_0 = arith.constant 0 : i32
    return %arg0, %c0_i32 : i32, i32
  }
  func.func @transform_1(%arg0: i32) -> (i32, i32) {
    %c0_i32 = arith.constant 0 : i32
    %c0_i32_0 = arith.constant 0 : i32
    %c0_i32_1 = arith.constant 0 : i32
    return %c0_i32, %c0_i32_0 : i32, i32
  }
  func.func @transform_2(%arg0: i32) -> (i32, i32) {
    %c0_i32 = arith.constant 0 : i32
    %c0_i32_0 = arith.constant 0 : i32
    %c0_i32_1 = arith.constant 0 : i32
    return %c0_i32, %c0_i32_0 : i32, i32
  }
  func.func @transform_3(%arg0: i32) -> (i32, i32) {
    %c0_i32 = arith.constant 0 : i32
    %c0_i32_0 = arith.constant 0 : i32
    %c0_i32_1 = arith.constant 0 : i32
    return %c0_i32, %c0_i32_0 : i32, i32
  }
  func.func @transform_4(%arg0: i32) -> (i32, i32) {
    %c0_i32 = arith.constant 0 : i32
    %c0_i32_0 = arith.constant 0 : i32
    %c0_i32_1 = arith.constant 0 : i32
    return %c0_i32, %c0_i32_0 : i32, i32
  }
  func.func @transform_5(%arg0: i32) -> (i32, i32) {
    %c0_i32 = arith.constant 0 : i32
    %c0_i32_0 = arith.constant 0 : i32
    return %arg0, %c0_i32 : i32, i32
  }
}

</mosaic_0001>

<bundles_post_ra>
// kernel: tpu_custom_call.1
= control target key start
LH: loop header
LB: loop body
LE: loop exit
PB: predicated region body
PF: predicated region fallthrough
CT: control target
= control target key end

     0   :  { %10 = vsyncpa [#allocation3], 0  ;;  %s369_s0 = inlined_call_operand.hbm [shape: f32[16,32], index: 0, kind: input, shape index: {}]   ;;  %s370_s1 = inlined_call_operand.vmem [shape: f32[1,32], index: 1, kind: input, shape index: {}]   ;;  %s371_s2 = inlined_call_operand.vmem [shape: f32[1,32], index: 2, kind: input, shape index: {}]   ;;  %s372_s3 = inlined_call_operand.hbm [shape: bf16[32,32], index: 3, kind: input, shape index: {}]   ;;  %s373_s4 = inlined_call_operand.vmem [shape: f32[1,32], index: 4, kind: input, shape index: {}]   ;;  %s374_s5 = inlined_call_operand.hbm [shape: f32[16,32], index: 5, kind: output, shape index: {}]  }
   0x1   :  { %11 = vsyncpa [#allocation6], 0 }
   0x2   :  { %12 = vsyncpa [#allocation4], 0  ;;  %s292_s18 = smov [#allocation2]  }
   0x3   :  { %s18_s19 = sshll.u32 %s292_s18, 4  ;;  %s19_s19 = int_to_ptr.vmem [resolvable:$true] %s18_s19 }
   0x4   :  { %s234_s20 = scalar_lea.vmem %s19_s19, 256  ;;  %p239_p1 = scmp.lt.s32.totalorder %s19_s19, %s19_s19 }
   0x5   :  { %p235_p0 = scmp.ne.s32.totalorder %s19_s19, %s234_s20  ;;  %p240_p2 = scmp.lt.s32.totalorder %s234_s20, %s234_s20 }
   0x7   :  { %p241_p3 = por %p240_p2, %p239_p1 }
   0x9   :  { %p242_p4 = pnand %p241_p3, %p235_p0 }
   0xb   :  { %245 = shalt.err (!%p242_p4)
}
   0xc   :  { %s293_s21 = smov 128   ;;  %s294_s22 = smov 8  }
   0xd   :  { %24 = dma.hbm_to_vmem [thread:$0]  %s369_s0, 256, %s19_s19, [#allocation3], %s293_s21, %s293_s21, %s294_s22  }
   0xe   :  { %s295_s25 = smov [#allocation5]  }
   0xf   :  { %s34_s26 = sshll.u32 %s295_s25, 4  ;;  %s35_s26 = int_to_ptr.vmem [resolvable:$true] %s34_s26 }
  0x10   :  { %s254_s27 = scalar_lea.vmem %s35_s26, 256  ;;  %p259_p6 = scmp.lt.s32.totalorder %s35_s26, %s35_s26 }
  0x11   :  { %p255_p5 = scmp.ne.s32.totalorder %s35_s26, %s254_s27  ;;  %p260_p7 = scmp.lt.s32.totalorder %s254_s27, %s254_s27 }
  0x13   :  { %p261_p8 = por %p260_p7, %p259_p6 }
  0x15   :  { %p262_p9 = pnand %p261_p8, %p255_p5 }
  0x17   :  { %265 = shalt.err (!%p262_p9)
}
  0x18   :  { %s296_s28 = smov 64   ;;  %s297_s29 = smov 4  }
  0x19   :  { %40 = dma.hbm_to_vmem [thread:$0]  %s372_s3, 256, %s35_s26, [#allocation6], %s296_s28, %s296_s28, %s297_s29  }
  0x1a   :  { %286 = dma.done.wait [#allocation3], 256  }
  0x1b   :  { %287 = vsyncadd [#allocation3], 4294967040 }
  0x1c   :  { %288 = dma.done.wait [#allocation6], 256  }
  0x1d   :  { %289 = vsyncadd [#allocation6], 4294967040  ;;  %vm55_vm0 = vcmask 261120   ;;  %v50_v0 = vld [vmem:[#allocation2] sm:$0xff]  ;;  %v340_v1 = vld [vmem:[#allocation2 + $0x8] sm:$0xff]  ;;  %v298_v9 = vmov 0.0  }
  0x1e   :  { %v56_v2 = vsel %vm55_vm0, %v50_v0, 0.0  ;;  %v65_v3 = vmul.f32 %v50_v0, %v50_v0  ;;  %v66_v4 = vmul.f32 %v340_v1, %v340_v1  ;;  %v59_v6 = vsel %vm55_vm0, %v340_v1, 0.0  ;;  %v220_v8 = vld [vmem:[#allocation5 + $0x8] sm:$0xff]   ;;  %203 = vmatprep.subr.bf16.mxu0 %v298_v9  ;;  %v221_v10 = vld [vmem:[#allocation5] sm:$0xff]   ;;  %v194_v30 = vld [vmem:[%s370_s1] ss:$0 sm:$0xff] }
  0x1f   :  { %57 = vadd.xlane.f32.xlu0 %v56_v2  ;;  %vm299_vm1 = vmmov 0   ;;  %204 = vmatpush3.bf16.msra.mxu0 %v220_v8  ;;  %v195_v35 = vld [vmem:[%s371_s2] ss:$0 sm:$0xff]  ;;  %s300_s1 = smov [#allocation7]  }
  0x20   :  { %v67_v5 = vsel %vm55_vm0, %v65_v3, 0.0  ;;  %v70_v7 = vsel %vm55_vm0, %v66_v4, 0.0  ;;  %207 = vmatprep.mubr.msk.bf16.mxu0 %vm299_vm1, %v298_v9  ;;  %205 = vmatprep.subr.bf16.mxu0 %v298_v9  ;;  %v196_v40 = vld [vmem:[%s373_s4] ss:$0 sm:$0xff]  ;;  %s181_s11 = sshll.u32 %s300_s1, 4  ;;  %s182_s11 = int_to_ptr.vmem [resolvable:$true] %s181_s11 }
  0x21   :  { %68 = vadd.xlane.f32.xlu1 %v67_v5  ;;  %s266_s2 = scalar_lea.vmem %s182_s11, 256  ;;  %p271_p11 = scmp.lt.s32.totalorder %s182_s11, %s182_s11 }
  0x22   :  { %p267_p10 = scmp.ne.s32.totalorder %s182_s11, %s266_s2  ;;  %p272_p12 = scmp.lt.s32.totalorder %s266_s2, %s266_s2 }
  0x23   :  { %60 = vadd.xlane.f32.xlu0 %v59_v6  ;;  %206 = vmatpush3.bf16.msra.mxu0 %v221_v10 }
  0x24   :  { %p273_p13 = por %p272_p12, %p271_p11 }
  0x25   :  { %71 = vadd.xlane.f32.xlu1 %v70_v7 }
  0x26   :  { %p274_p0 = pnand %p273_p13, %p267_p10 }
  0xa8   :  { %v58_v11 = vpop.xlane.xlu0 %57 }
  0xa9   :  { %v63_v12 = vmul.f32 0.03125, %v58_v11 }
  0xaa   :  { %v69_v13 = vpop.xlane.xlu1 %68 }
  0xab   :  { %v75_v14 = vmul.f32 %v63_v12, %v63_v12  ;;  %v73_v15 = vmul.f32 0.03125, %v69_v13  ;;  %v81_v27 = vsub.f32 %v50_v0, %v63_v12 }
  0xac   :  { %v61_v16 = vpop.xlane.xlu0 %60 }
  0xad   :  { %v77_v17 = vsub.f32 %v73_v15, %v75_v14  ;;  %v64_v18 = vmul.f32 0.03125, %v61_v16 }
  0xae   :  { %v72_v19 = vpop.xlane.xlu1 %71 }
  0xaf   :  { %v79_v20 = vmax.f32 %v77_v17, 0.0  ;;  %v76_v21 = vmul.f32 %v64_v18, %v64_v18  ;;  %v74_v22 = vmul.f32 0.03125, %v72_v19  ;;  %v82_v31 = vsub.f32 %v340_v1, %v64_v18 }
  0xb1   :  { %v83_v23 = vadd.f32 1e-05, %v79_v20  ;;  %v78_v24 = vsub.f32 %v74_v22, %v76_v21 }
  0xb3   :  { %222 = vrsqrt.f32 %v83_v23  ;;  %v80_v25 = vmax.f32 %v78_v24, 0.0 }
  0xb5   :  { %v84_v26 = vadd.f32 1e-05, %v80_v25 }
  0xb7   :  { %224 = vrsqrt.f32 %v84_v26 }
  0xc0   :  { %v223_v28 = vpop.eup %222 }
  0xc1   :  { %v87_v29 = vmul.f32 %v223_v28, %v81_v27 }
  0xc3   :  { %v95_v34 = vmul.f32 %v194_v30, %v87_v29 }
  0xc4   :  { %v225_v32 = vpop.eup %224 }
  0xc5   :  { %v88_v33 = vmul.f32 %v225_v32, %v82_v31  ;;  %v103_v37 = vadd.f32 %v195_v35, %v95_v34 }
  0xc7   :  { %v96_v36 = vmul.f32 %v194_v30, %v88_v33 }
  0xc9   :  { %v104_v38 = vadd.f32 %v195_v35, %v96_v36 }
  0xcb   :  { %v105_v39 = vpack.c.bf16 %v104_v38, %v103_v37 }
  0xcd   :  { %208 = vmatmul.mubr.msk.bf16.vlgmr.msra.gmra.mxu0 %vm55_vm0, %v105_v39 }
 0x18d   :  { %v165_v41 = vpop.f32.mrf.mxu0 }
 0x18e   :  { %v166_v42 = vadd.f32 %v196_v40, %v165_v41 }
 0x18f   :  { %v209_v43 = vpop.f32.mrf.mxu0 }
 0x190   :  { %v172_v44 = vadd.f32 %v166_v42, %v50_v0 }
 0x191   :  { %v168_v45 = vpop.f32.mrf.mxu0 }
 0x192   :  { %174 = vst.msk [vmem:[#allocation7] sm:$0xff] %vm55_vm0, %v172_v44  ;;  %v169_v46 = vadd.f32 %v196_v40, %v168_v45 }
 0x193   :  { %v210_v47 = vpop.f32.mrf.mxu0 }
 0x194   :  { %v173_v48 = vadd.f32 %v169_v46, %v340_v1 }
 0x196   :  { %175 = vst.msk [vmem:[#allocation7 + $0x8] sm:$0xff] %vm55_vm0, %v173_v48 }
 0x197   :  { %277 = shalt.err (!%p274_p0)
}
 0x198   :  { %187 = dma.vmem_to_hbm [thread:$0]  %s182_s11, 256, %s374_s5, [#allocation4], %s293_s21, %s293_s21, %s294_s22  }
 0x199   :  { %290 = dma.done.wait [#allocation4], 256  }
 0x19a   :  { %291 = vsyncadd [#allocation4], 4294967040 }
 0x19b   :  { %191 = vsyncpa [#allocation3], 1 }
 0x19c   :  { %192 = vsyncpa [#allocation6], 1 }
 0x19d   :  { %193 = vsyncpa [#allocation4], 1 }

</bundles_post_ra>
